<compile_context>
chip_gen: v6e
topology: v6e:2x2x1
jax: 0.10.0
libtpu: 0.0.40
codegen_flags: <defaults>
</compile_context>

<pallas_src>
import jax
import jax.numpy as jnp
from jax.experimental import pallas as pl
from jax.experimental.pallas import tpu as pltpu

_SMALL_BYTES = 1 << 20    # below this, XLA-native copy beats a Pallas launch
_MAX_CHUNKS = 8           # max concurrently-outstanding DMAs
_NUM_ISSUE_STEPS = 2      # grid steps issuing DMAs (sharded across TCs on v7x)


def _make_identity_dma_kernel(chunks, n_steps):
    """chunks: tuple of (lo, size, owner_step) — all static Python ints."""

    def kernel(x_hbm, o_hbm, sems):
        # Build all chunk copy descriptors (static slices of the leading axis;
        # trailing dims stay whole, so each DMA is a contiguous slab and the
        # offsets are compile-time constants — no dynamic/strided descriptors).
        copies = []
        for c, (lo, sz, owner) in enumerate(chunks):
            cp = pltpu.make_async_copy(
                x_hbm.at[pl.ds(lo, sz)],
                o_hbm.at[pl.ds(lo, sz)],
                sems.at[c],
            )
            copies.append((cp, owner))

        if n_steps > 1:
            pid = pl.program_id(0)
            # Issue every DMA owned by this grid step back-to-back ...
            for cp, owner in copies:
                @pl.when(pid == owner)
                def _(cp=cp):
                    cp.start()
            # ... then wait on all of them (multiple DMAs stay in flight).
            for cp, owner in copies:
                @pl.when(pid == owner)
                def _(cp=cp):
                    cp.wait()
        else:
            for cp, _ in copies:
                cp.start()
            for cp, _ in copies:
                cp.wait()

    return kernel


def _identity_copy_pallas(x):
    """Materialize a fresh array equal to x via chunked HBM->HBM DMAs."""
    lead = x.shape[0]
    n_chunks = max(1, min(_MAX_CHUNKS, lead))
    n_steps = _NUM_ISSUE_STEPS if n_chunks >= _NUM_ISSUE_STEPS else 1

    # Static, near-even chunk boundaries along the leading axis only.
    base, rem = divmod(lead, n_chunks)
    chunks = []
    lo = 0
    for c in range(n_chunks):
        sz = base + (1 if c < rem else 0)
        owner = (c * n_steps) // n_chunks  # first half -> step 0, second -> step 1
        chunks.append((lo, sz, owner))
        lo += sz
    chunks = tuple(chunks)

    nbytes = x.size * x.dtype.itemsize
    grid = (n_steps,) if n_steps > 1 else ()
    compiler_params = pltpu.CompilerParams(
        dimension_semantics=(("parallel",) * len(grid)) if grid else None,
    )

    return pl.pallas_call(
        _make_identity_dma_kernel(chunks, n_steps),
        out_shape=jax.ShapeDtypeStruct(x.shape, x.dtype),
        grid_spec=pltpu.PrefetchScalarGridSpec(
            num_scalar_prefetch=0,
            grid=grid,
            in_specs=[pl.BlockSpec(memory_space=pl.ANY)],
            out_specs=pl.BlockSpec(memory_space=pl.ANY),
            scratch_shapes=[pltpu.SemaphoreType.DMA((n_chunks,))],
        ),
        compiler_params=compiler_params,
        cost_estimate=pl.CostEstimate(
            flops=0, transcendentals=0, bytes_accessed=2 * nbytes),
    )(x)


def identity_pallas(x, *, materialize=False):
    """Identity.forward(x) == x.

    Default (materialize=False): return x unchanged — the correct and fastest
    implementation of Identity.

    materialize=True: return a freshly allocated buffer equal to x.  Tiny
    tensors use an XLA-native copy; larger ones use the chunked multi-DMA
    Pallas kernel above (pure HBM-bandwidth bound, no VMEM round trip).
    """
    if not materialize:
        return x
    if x.size == 0:
        return jnp.empty_like(x)          # fresh (empty) buffer, nothing to copy
    if x.ndim == 0 or x.size * x.dtype.itemsize < _SMALL_BYTES:
        return jnp.copy(x)                # small-array bypass: skip Pallas launch
    return _identity_copy_pallas(x)
    # TODO(synk): optional deferred variant (return DMA semaphore + output ref as
    # cross-call futures) if a downstream pallas_call consumer wants to hide the copy.


if __name__ == "__main__":
    key = jax.random.PRNGKey(0)
    k1, k2 = jax.random.split(key)

    # Small feature tensor matching the module's typical usage.
    x = jax.random.normal(k1, (2, 4, 16, 16), dtype=jnp.float32)

    # 1) Production path: identity is free — no kernel, no copy.
    y_fast = identity_pallas(x)
    jax.block_until_ready(y_fast)
    assert y_fast.shape == x.shape and y_fast.dtype == x.dtype
    assert bool(jnp.all(y_fast == x))

    # 2) Fresh-buffer path on a tiny tensor: XLA-native copy bypass.
    y_small = identity_pallas(x, materialize=True)
    jax.block_until_ready(y_small)
    assert y_small.shape == x.shape and y_small.dtype == x.dtype
    assert bool(jnp.all(y_small == x))

    # 3) Fresh-buffer path on a larger tensor: chunked multi-DMA Pallas kernel
    #    (2 MiB -> 8 outstanding DMAs split across a 2-step parallel grid).
    x_big = jax.random.normal(k2, (512, 1024), dtype=jnp.float32)
    y_big = identity_pallas(x_big, materialize=True)
    jax.block_until_ready(y_big)
    assert y_big.shape == x_big.shape and y_big.dtype == x_big.dtype
    assert bool(jnp.all(y_big == x_big))

    print("KERNEL_OK")
</pallas_src>

<mosaic_0001>
module attributes {stable_mosaic.version = 11 : i64} {
  func.func @kernel(%arg0: i32, %arg1: memref<512x1024xf32, #tpu.memory_space<any>>, %arg2: memref<512x1024xf32, #tpu.memory_space<any>>, %arg3: memref<8x!tpu.dma_semaphore, #tpu.memory_space<semaphore_mem>>) attributes {dimension_semantics = [#tpu.dimension_semantics<parallel>], iteration_bounds = array<i64: 2>, scalar_prefetch = 0 : i64, scratch_operands = 1 : i64, tpu.core_type = #tpu.core_type<tc>, window_params = [{}, {}]} {
    %c0_i32 = arith.constant 0 : i32
    %0 = arith.cmpi eq, %arg0, %c0_i32 : i32
    %1 = arith.extui %0 : i1 to i32
    %c0_i32_0 = arith.constant 0 : i32
    %c0_i32_1 = arith.constant 0 : i32
    %2 = arith.cmpi ne, %1, %c0_i32_1 : i32
    scf.if %2 {
      %c0_i32_40 = arith.constant 0 : i32
      %c0_i32_41 = arith.constant 0 : i32
      %48 = tpu.memref_slice %arg1[%c0_i32_40, %c0_i32_41] : memref<512x1024xf32, #tpu.memory_space<any>> -> memref<64x1024xf32, #tpu.memory_space<any>>
      %c0_i32_42 = arith.constant 0 : i32
      %c0_i32_43 = arith.constant 0 : i32
      %49 = tpu.memref_slice %arg2[%c0_i32_42, %c0_i32_43] : memref<512x1024xf32, #tpu.memory_space<any>> -> memref<64x1024xf32, #tpu.memory_space<any>>
      %50 = tpu.memref_slice %arg3[%c0_i32_0] : memref<8x!tpu.dma_semaphore, #tpu.memory_space<semaphore_mem>> -> memref<1x!tpu.dma_semaphore, #tpu.memory_space<semaphore_mem>>
      %51 = tpu.memref_squeeze %50 : memref<1x!tpu.dma_semaphore, #tpu.memory_space<semaphore_mem>> -> memref<!tpu.dma_semaphore, #tpu.memory_space<semaphore_mem>>
      tpu.enqueue_dma source(%48 : memref<64x1024xf32, #tpu.memory_space<any>>) target(%49 : memref<64x1024xf32, #tpu.memory_space<any>>) target_semaphore(%51 : memref<!tpu.dma_semaphore, #tpu.memory_space<semaphore_mem>>)
    } else {
    }
    %c0_i32_2 = arith.constant 0 : i32
    %3 = arith.cmpi eq, %arg0, %c0_i32_2 : i32
    %4 = arith.extui %3 : i1 to i32
    %c1_i32 = arith.constant 1 : i32
    %c0_i32_3 = arith.constant 0 : i32
    %5 = arith.cmpi ne, %4, %c0_i32_3 : i32
    scf.if %5 {
      %c64_i32 = arith.constant 64 : i32
      %c0_i32_40 = arith.constant 0 : i32
      %48 = tpu.memref_slice %arg1[%c64_i32, %c0_i32_40] : memref<512x1024xf32, #tpu.memory_space<any>> -> memref<64x1024xf32, #tpu.memory_space<any>>
      %c64_i32_41 = arith.constant 64 : i32
      %c0_i32_42 = arith.constant 0 : i32
      %49 = tpu.memref_slice %arg2[%c64_i32_41, %c0_i32_42] : memref<512x1024xf32, #tpu.memory_space<any>> -> memref<64x1024xf32, #tpu.memory_space<any>>
      %50 = tpu.memref_slice %arg3[%c1_i32] : memref<8x!tpu.dma_semaphore, #tpu.memory_space<semaphore_mem>> -> memref<1x!tpu.dma_semaphore, #tpu.memory_space<semaphore_mem>>
      %51 = tpu.memref_squeeze %50 : memref<1x!tpu.dma_semaphore, #tpu.memory_space<semaphore_mem>> -> memref<!tpu.dma_semaphore, #tpu.memory_space<semaphore_mem>>
      tpu.enqueue_dma source(%48 : memref<64x1024xf32, #tpu.memory_space<any>>) target(%49 : memref<64x1024xf32, #tpu.memory_space<any>>) target_semaphore(%51 : memref<!tpu.dma_semaphore, #tpu.memory_space<semaphore_mem>>)
    } else {
    }
    %c0_i32_4 = arith.constant 0 : i32
    %6 = arith.cmpi eq, %arg0, %c0_i32_4 : i32
    %7 = arith.extui %6 : i1 to i32
    %c2_i32 = arith.constant 2 : i32
    %c0_i32_5 = arith.constant 0 : i32
    %8 = arith.cmpi ne, %7, %c0_i32_5 : i32
    scf.if %8 {
      %c128_i32 = arith.constant 128 : i32
      %c0_i32_40 = arith.constant 0 : i32
      %48 = tpu.memref_slice %arg1[%c128_i32, %c0_i32_40] : memref<512x1024xf32, #tpu.memory_space<any>> -> memref<64x1024xf32, #tpu.memory_space<any>>
      %c128_i32_41 = arith.constant 128 : i32
      %c0_i32_42 = arith.constant 0 : i32
      %49 = tpu.memref_slice %arg2[%c128_i32_41, %c0_i32_42] : memref<512x1024xf32, #tpu.memory_space<any>> -> memref<64x1024xf32, #tpu.memory_space<any>>
      %50 = tpu.memref_slice %arg3[%c2_i32] : memref<8x!tpu.dma_semaphore, #tpu.memory_space<semaphore_mem>> -> memref<1x!tpu.dma_semaphore, #tpu.memory_space<semaphore_mem>>
      %51 = tpu.memref_squeeze %50 : memref<1x!tpu.dma_semaphore, #tpu.memory_space<semaphore_mem>> -> memref<!tpu.dma_semaphore, #tpu.memory_space<semaphore_mem>>
      tpu.enqueue_dma source(%48 : memref<64x1024xf32, #tpu.memory_space<any>>) target(%49 : memref<64x1024xf32, #tpu.memory_space<any>>) target_semaphore(%51 : memref<!tpu.dma_semaphore, #tpu.memory_space<semaphore_mem>>)
    } else {
    }
    %c0_i32_6 = arith.constant 0 : i32
    %9 = arith.cmpi eq, %arg0, %c0_i32_6 : i32
    %10 = arith.extui %9 : i1 to i32
    %c3_i32 = arith.constant 3 : i32
    %c0_i32_7 = arith.constant 0 : i32
    %11 = arith.cmpi ne, %10, %c0_i32_7 : i32
    scf.if %11 {
      %c192_i32 = arith.constant 192 : i32
      %c0_i32_40 = arith.constant 0 : i32
      %48 = tpu.memref_slice %arg1[%c192_i32, %c0_i32_40] : memref<512x1024xf32, #tpu.memory_space<any>> -> memref<64x1024xf32, #tpu.memory_space<any>>
      %c192_i32_41 = arith.constant 192 : i32
      %c0_i32_42 = arith.constant 0 : i32
      %49 = tpu.memref_slice %arg2[%c192_i32_41, %c0_i32_42] : memref<512x1024xf32, #tpu.memory_space<any>> -> memref<64x1024xf32, #tpu.memory_space<any>>
      %50 = tpu.memref_slice %arg3[%c3_i32] : memref<8x!tpu.dma_semaphore, #tpu.memory_space<semaphore_mem>> -> memref<1x!tpu.dma_semaphore, #tpu.memory_space<semaphore_mem>>
      %51 = tpu.memref_squeeze %50 : memref<1x!tpu.dma_semaphore, #tpu.memory_space<semaphore_mem>> -> memref<!tpu.dma_semaphore, #tpu.memory_space<semaphore_mem>>
      tpu.enqueue_dma source(%48 : memref<64x1024xf32, #tpu.memory_space<any>>) target(%49 : memref<64x1024xf32, #tpu.memory_space<any>>) target_semaphore(%51 : memref<!tpu.dma_semaphore, #tpu.memory_space<semaphore_mem>>)
    } else {
    }
    %c1_i32_8 = arith.constant 1 : i32
    %12 = arith.cmpi eq, %arg0, %c1_i32_8 : i32
    %13 = arith.extui %12 : i1 to i32
    %c4_i32 = arith.constant 4 : i32
    %c0_i32_9 = arith.constant 0 : i32
    %14 = arith.cmpi ne, %13, %c0_i32_9 : i32
    scf.if %14 {
      %c256_i32 = arith.constant 256 : i32
      %c0_i32_40 = arith.constant 0 : i32
      %48 = tpu.memref_slice %arg1[%c256_i32, %c0_i32_40] : memref<512x1024xf32, #tpu.memory_space<any>> -> memref<64x1024xf32, #tpu.memory_space<any>>
      %c256_i32_41 = arith.constant 256 : i32
      %c0_i32_42 = arith.constant 0 : i32
      %49 = tpu.memref_slice %arg2[%c256_i32_41, %c0_i32_42] : memref<512x1024xf32, #tpu.memory_space<any>> -> memref<64x1024xf32, #tpu.memory_space<any>>
      %50 = tpu.memref_slice %arg3[%c4_i32] : memref<8x!tpu.dma_semaphore, #tpu.memory_space<semaphore_mem>> -> memref<1x!tpu.dma_semaphore, #tpu.memory_space<semaphore_mem>>
      %51 = tpu.memref_squeeze %50 : memref<1x!tpu.dma_semaphore, #tpu.memory_space<semaphore_mem>> -> memref<!tpu.dma_semaphore, #tpu.memory_space<semaphore_mem>>
      tpu.enqueue_dma source(%48 : memref<64x1024xf32, #tpu.memory_space<any>>) target(%49 : memref<64x1024xf32, #tpu.memory_space<any>>) target_semaphore(%51 : memref<!tpu.dma_semaphore, #tpu.memory_space<semaphore_mem>>)
    } else {
    }
    %c1_i32_10 = arith.constant 1 : i32
    %15 = arith.cmpi eq, %arg0, %c1_i32_10 : i32
    %16 = arith.extui %15 : i1 to i32
    %c5_i32 = arith.constant 5 : i32
    %c0_i32_11 = arith.constant 0 : i32
    %17 = arith.cmpi ne, %16, %c0_i32_11 : i32
    scf.if %17 {
      %c320_i32 = arith.constant 320 : i32
      %c0_i32_40 = arith.constant 0 : i32
      %48 = tpu.memref_slice %arg1[%c320_i32, %c0_i32_40] : memref<512x1024xf32, #tpu.memory_space<any>> -> memref<64x1024xf32, #tpu.memory_space<any>>
      %c320_i32_41 = arith.constant 320 : i32
      %c0_i32_42 = arith.constant 0 : i32
      %49 = tpu.memref_slice %arg2[%c320_i32_41, %c0_i32_42] : memref<512x1024xf32, #tpu.memory_space<any>> -> memref<64x1024xf32, #tpu.memory_space<any>>
      %50 = tpu.memref_slice %arg3[%c5_i32] : memref<8x!tpu.dma_semaphore, #tpu.memory_space<semaphore_mem>> -> memref<1x!tpu.dma_semaphore, #tpu.memory_space<semaphore_mem>>
      %51 = tpu.memref_squeeze %50 : memref<1x!tpu.dma_semaphore, #tpu.memory_space<semaphore_mem>> -> memref<!tpu.dma_semaphore, #tpu.memory_space<semaphore_mem>>
      tpu.enqueue_dma source(%48 : memref<64x1024xf32, #tpu.memory_space<any>>) target(%49 : memref<64x1024xf32, #tpu.memory_space<any>>) target_semaphore(%51 : memref<!tpu.dma_semaphore, #tpu.memory_space<semaphore_mem>>)
    } else {
    }
    %c1_i32_12 = arith.constant 1 : i32
    %18 = arith.cmpi eq, %arg0, %c1_i32_12 : i32
    %19 = arith.extui %18 : i1 to i32
    %c6_i32 = arith.constant 6 : i32
    %c0_i32_13 = arith.constant 0 : i32
    %20 = arith.cmpi ne, %19, %c0_i32_13 : i32
    scf.if %20 {
      %c384_i32 = arith.constant 384 : i32
      %c0_i32_40 = arith.constant 0 : i32
      %48 = tpu.memref_slice %arg1[%c384_i32, %c0_i32_40] : memref<512x1024xf32, #tpu.memory_space<any>> -> memref<64x1024xf32, #tpu.memory_space<any>>
      %c384_i32_41 = arith.constant 384 : i32
      %c0_i32_42 = arith.constant 0 : i32
      %49 = tpu.memref_slice %arg2[%c384_i32_41, %c0_i32_42] : memref<512x1024xf32, #tpu.memory_space<any>> -> memref<64x1024xf32, #tpu.memory_space<any>>
      %50 = tpu.memref_slice %arg3[%c6_i32] : memref<8x!tpu.dma_semaphore, #tpu.memory_space<semaphore_mem>> -> memref<1x!tpu.dma_semaphore, #tpu.memory_space<semaphore_mem>>
      %51 = tpu.memref_squeeze %50 : memref<1x!tpu.dma_semaphore, #tpu.memory_space<semaphore_mem>> -> memref<!tpu.dma_semaphore, #tpu.memory_space<semaphore_mem>>
      tpu.enqueue_dma source(%48 : memref<64x1024xf32, #tpu.memory_space<any>>) target(%49 : memref<64x1024xf32, #tpu.memory_space<any>>) target_semaphore(%51 : memref<!tpu.dma_semaphore, #tpu.memory_space<semaphore_mem>>)
    } else {
    }
    %c1_i32_14 = arith.constant 1 : i32
    %21 = arith.cmpi eq, %arg0, %c1_i32_14 : i32
    %22 = arith.extui %21 : i1 to i32
    %c7_i32 = arith.constant 7 : i32
    %c0_i32_15 = arith.constant 0 : i32
    %23 = arith.cmpi ne, %22, %c0_i32_15 : i32
    scf.if %23 {
      %c448_i32 = arith.constant 448 : i32
      %c0_i32_40 = arith.constant 0 : i32
      %48 = tpu.memref_slice %arg1[%c448_i32, %c0_i32_40] : memref<512x1024xf32, #tpu.memory_space<any>> -> memref<64x1024xf32, #tpu.memory_space<any>>
      %c448_i32_41 = arith.constant 448 : i32
      %c0_i32_42 = arith.constant 0 : i32
      %49 = tpu.memref_slice %arg2[%c448_i32_41, %c0_i32_42] : memref<512x1024xf32, #tpu.memory_space<any>> -> memref<64x1024xf32, #tpu.memory_space<any>>
      %50 = tpu.memref_slice %arg3[%c7_i32] : memref<8x!tpu.dma_semaphore, #tpu.memory_space<semaphore_mem>> -> memref<1x!tpu.dma_semaphore, #tpu.memory_space<semaphore_mem>>
      %51 = tpu.memref_squeeze %50 : memref<1x!tpu.dma_semaphore, #tpu.memory_space<semaphore_mem>> -> memref<!tpu.dma_semaphore, #tpu.memory_space<semaphore_mem>>
      tpu.enqueue_dma source(%48 : memref<64x1024xf32, #tpu.memory_space<any>>) target(%49 : memref<64x1024xf32, #tpu.memory_space<any>>) target_semaphore(%51 : memref<!tpu.dma_semaphore, #tpu.memory_space<semaphore_mem>>)
    } else {
    }
    %c0_i32_16 = arith.constant 0 : i32
    %24 = arith.cmpi eq, %arg0, %c0_i32_16 : i32
    %25 = arith.extui %24 : i1 to i32
    %c0_i32_17 = arith.constant 0 : i32
    %c0_i32_18 = arith.constant 0 : i32
    %26 = arith.cmpi ne, %25, %c0_i32_18 : i32
    scf.if %26 {
      %c0_i32_40 = arith.constant 0 : i32
      %c0_i32_41 = arith.constant 0 : i32
      %48 = tpu.memref_slice %arg1[%c0_i32_40, %c0_i32_41] : memref<512x1024xf32, #tpu.memory_space<any>> -> memref<64x1024xf32, #tpu.memory_space<any>>
      %c0_i32_42 = arith.constant 0 : i32
      %c0_i32_43 = arith.constant 0 : i32
      %49 = tpu.memref_slice %arg2[%c0_i32_42, %c0_i32_43] : memref<512x1024xf32, #tpu.memory_space<any>> -> memref<64x1024xf32, #tpu.memory_space<any>>
      %50 = tpu.memref_slice %arg3[%c0_i32_17] : memref<8x!tpu.dma_semaphore, #tpu.memory_space<semaphore_mem>> -> memref<1x!tpu.dma_semaphore, #tpu.memory_space<semaphore_mem>>
      %51 = tpu.memref_squeeze %50 : memref<1x!tpu.dma_semaphore, #tpu.memory_space<semaphore_mem>> -> memref<!tpu.dma_semaphore, #tpu.memory_space<semaphore_mem>>
      tpu.wait_dma2 semaphore(%51 : memref<!tpu.dma_semaphore, #tpu.memory_space<semaphore_mem>>) src(%48 : memref<64x1024xf32, #tpu.memory_space<any>>) dst(%49 : memref<64x1024xf32, #tpu.memory_space<any>>)
    } else {
    }
    %c0_i32_19 = arith.constant 0 : i32
    %27 = arith.cmpi eq, %arg0, %c0_i32_19 : i32
    %28 = arith.extui %27 : i1 to i32
    %c1_i32_20 = arith.constant 1 : i32
    %c0_i32_21 = arith.constant 0 : i32
    %29 = arith.cmpi ne, %28, %c0_i32_21 : i32
    scf.if %29 {
      %c64_i32 = arith.constant 64 : i32
      %c0_i32_40 = arith.constant 0 : i32
      %48 = tpu.memref_slice %arg1[%c64_i32, %c0_i32_40] : memref<512x1024xf32, #tpu.memory_space<any>> -> memref<64x1024xf32, #tpu.memory_space<any>>
      %c64_i32_41 = arith.constant 64 : i32
      %c0_i32_42 = arith.constant 0 : i32
      %49 = tpu.memref_slice %arg2[%c64_i32_41, %c0_i32_42] : memref<512x1024xf32, #tpu.memory_space<any>> -> memref<64x1024xf32, #tpu.memory_space<any>>
      %50 = tpu.memref_slice %arg3[%c1_i32_20] : memref<8x!tpu.dma_semaphore, #tpu.memory_space<semaphore_mem>> -> memref<1x!tpu.dma_semaphore, #tpu.memory_space<semaphore_mem>>
      %51 = tpu.memref_squeeze %50 : memref<1x!tpu.dma_semaphore, #tpu.memory_space<semaphore_mem>> -> memref<!tpu.dma_semaphore, #tpu.memory_space<semaphore_mem>>
      tpu.wait_dma2 semaphore(%51 : memref<!tpu.dma_semaphore, #tpu.memory_space<semaphore_mem>>) src(%48 : memref<64x1024xf32, #tpu.memory_space<any>>) dst(%49 : memref<64x1024xf32, #tpu.memory_space<any>>)
    } else {
    }
    %c0_i32_22 = arith.constant 0 : i32
    %30 = arith.cmpi eq, %arg0, %c0_i32_22 : i32
    %31 = arith.extui %30 : i1 to i32
    %c2_i32_23 = arith.constant 2 : i32
    %c0_i32_24 = arith.constant 0 : i32
    %32 = arith.cmpi ne, %31, %c0_i32_24 : i32
    scf.if %32 {
      %c128_i32 = arith.constant 128 : i32
      %c0_i32_40 = arith.constant 0 : i32
      %48 = tpu.memref_slice %arg1[%c128_i32, %c0_i32_40] : memref<512x1024xf32, #tpu.memory_space<any>> -> memref<64x1024xf32, #tpu.memory_space<any>>
      %c128_i32_41 = arith.constant 128 : i32
      %c0_i32_42 = arith.constant 0 : i32
      %49 = tpu.memref_slice %arg2[%c128_i32_41, %c0_i32_42] : memref<512x1024xf32, #tpu.memory_space<any>> -> memref<64x1024xf32, #tpu.memory_space<any>>
      %50 = tpu.memref_slice %arg3[%c2_i32_23] : memref<8x!tpu.dma_semaphore, #tpu.memory_space<semaphore_mem>> -> memref<1x!tpu.dma_semaphore, #tpu.memory_space<semaphore_mem>>
      %51 = tpu.memref_squeeze %50 : memref<1x!tpu.dma_semaphore, #tpu.memory_space<semaphore_mem>> -> memref<!tpu.dma_semaphore, #tpu.memory_space<semaphore_mem>>
      tpu.wait_dma2 semaphore(%51 : memref<!tpu.dma_semaphore, #tpu.memory_space<semaphore_mem>>) src(%48 : memref<64x1024xf32, #tpu.memory_space<any>>) dst(%49 : memref<64x1024xf32, #tpu.memory_space<any>>)
    } else {
    }
    %c0_i32_25 = arith.constant 0 : i32
    %33 = arith.cmpi eq, %arg0, %c0_i32_25 : i32
    %34 = arith.extui %33 : i1 to i32
    %c3_i32_26 = arith.constant 3 : i32
    %c0_i32_27 = arith.constant 0 : i32
    %35 = arith.cmpi ne, %34, %c0_i32_27 : i32
    scf.if %35 {
      %c192_i32 = arith.constant 192 : i32
      %c0_i32_40 = arith.constant 0 : i32
      %48 = tpu.memref_slice %arg1[%c192_i32, %c0_i32_40] : memref<512x1024xf32, #tpu.memory_space<any>> -> memref<64x1024xf32, #tpu.memory_space<any>>
      %c192_i32_41 = arith.constant 192 : i32
      %c0_i32_42 = arith.constant 0 : i32
      %49 = tpu.memref_slice %arg2[%c192_i32_41, %c0_i32_42] : memref<512x1024xf32, #tpu.memory_space<any>> -> memref<64x1024xf32, #tpu.memory_space<any>>
      %50 = tpu.memref_slice %arg3[%c3_i32_26] : memref<8x!tpu.dma_semaphore, #tpu.memory_space<semaphore_mem>> -> memref<1x!tpu.dma_semaphore, #tpu.memory_space<semaphore_mem>>
      %51 = tpu.memref_squeeze %50 : memref<1x!tpu.dma_semaphore, #tpu.memory_space<semaphore_mem>> -> memref<!tpu.dma_semaphore, #tpu.memory_space<semaphore_mem>>
      tpu.wait_dma2 semaphore(%51 : memref<!tpu.dma_semaphore, #tpu.memory_space<semaphore_mem>>) src(%48 : memref<64x1024xf32, #tpu.memory_space<any>>) dst(%49 : memref<64x1024xf32, #tpu.memory_space<any>>)
    } else {
    }
    %c1_i32_28 = arith.constant 1 : i32
    %36 = arith.cmpi eq, %arg0, %c1_i32_28 : i32
    %37 = arith.extui %36 : i1 to i32
    %c4_i32_29 = arith.constant 4 : i32
    %c0_i32_30 = arith.constant 0 : i32
    %38 = arith.cmpi ne, %37, %c0_i32_30 : i32
    scf.if %38 {
      %c256_i32 = arith.constant 256 : i32
      %c0_i32_40 = arith.constant 0 : i32
      %48 = tpu.memref_slice %arg1[%c256_i32, %c0_i32_40] : memref<512x1024xf32, #tpu.memory_space<any>> -> memref<64x1024xf32, #tpu.memory_space<any>>
      %c256_i32_41 = arith.constant 256 : i32
      %c0_i32_42 = arith.constant 0 : i32
      %49 = tpu.memref_slice %arg2[%c256_i32_41, %c0_i32_42] : memref<512x1024xf32, #tpu.memory_space<any>> -> memref<64x1024xf32, #tpu.memory_space<any>>
      %50 = tpu.memref_slice %arg3[%c4_i32_29] : memref<8x!tpu.dma_semaphore, #tpu.memory_space<semaphore_mem>> -> memref<1x!tpu.dma_semaphore, #tpu.memory_space<semaphore_mem>>
      %51 = tpu.memref_squeeze %50 : memref<1x!tpu.dma_semaphore, #tpu.memory_space<semaphore_mem>> -> memref<!tpu.dma_semaphore, #tpu.memory_space<semaphore_mem>>
      tpu.wait_dma2 semaphore(%51 : memref<!tpu.dma_semaphore, #tpu.memory_space<semaphore_mem>>) src(%48 : memref<64x1024xf32, #tpu.memory_space<any>>) dst(%49 : memref<64x1024xf32, #tpu.memory_space<any>>)
    } else {
    }
    %c1_i32_31 = arith.constant 1 : i32
    %39 = arith.cmpi eq, %arg0, %c1_i32_31 : i32
    %40 = arith.extui %39 : i1 to i32
    %c5_i32_32 = arith.constant 5 : i32
    %c0_i32_33 = arith.constant 0 : i32
    %41 = arith.cmpi ne, %40, %c0_i32_33 : i32
    scf.if %41 {
      %c320_i32 = arith.constant 320 : i32
      %c0_i32_40 = arith.constant 0 : i32
      %48 = tpu.memref_slice %arg1[%c320_i32, %c0_i32_40] : memref<512x1024xf32, #tpu.memory_space<any>> -> memref<64x1024xf32, #tpu.memory_space<any>>
      %c320_i32_41 = arith.constant 320 : i32
      %c0_i32_42 = arith.constant 0 : i32
      %49 = tpu.memref_slice %arg2[%c320_i32_41, %c0_i32_42] : memref<512x1024xf32, #tpu.memory_space<any>> -> memref<64x1024xf32, #tpu.memory_space<any>>
      %50 = tpu.memref_slice %arg3[%c5_i32_32] : memref<8x!tpu.dma_semaphore, #tpu.memory_space<semaphore_mem>> -> memref<1x!tpu.dma_semaphore, #tpu.memory_space<semaphore_mem>>
      %51 = tpu.memref_squeeze %50 : memref<1x!tpu.dma_semaphore, #tpu.memory_space<semaphore_mem>> -> memref<!tpu.dma_semaphore, #tpu.memory_space<semaphore_mem>>
      tpu.wait_dma2 semaphore(%51 : memref<!tpu.dma_semaphore, #tpu.memory_space<semaphore_mem>>) src(%48 : memref<64x1024xf32, #tpu.memory_space<any>>) dst(%49 : memref<64x1024xf32, #tpu.memory_space<any>>)
    } else {
    }
    %c1_i32_34 = arith.constant 1 : i32
    %42 = arith.cmpi eq, %arg0, %c1_i32_34 : i32
    %43 = arith.extui %42 : i1 to i32
    %c6_i32_35 = arith.constant 6 : i32
    %c0_i32_36 = arith.constant 0 : i32
    %44 = arith.cmpi ne, %43, %c0_i32_36 : i32
    scf.if %44 {
      %c384_i32 = arith.constant 384 : i32
      %c0_i32_40 = arith.constant 0 : i32
      %48 = tpu.memref_slice %arg1[%c384_i32, %c0_i32_40] : memref<512x1024xf32, #tpu.memory_space<any>> -> memref<64x1024xf32, #tpu.memory_space<any>>
      %c384_i32_41 = arith.constant 384 : i32
      %c0_i32_42 = arith.constant 0 : i32
      %49 = tpu.memref_slice %arg2[%c384_i32_41, %c0_i32_42] : memref<512x1024xf32, #tpu.memory_space<any>> -> memref<64x1024xf32, #tpu.memory_space<any>>
      %50 = tpu.memref_slice %arg3[%c6_i32_35] : memref<8x!tpu.dma_semaphore, #tpu.memory_space<semaphore_mem>> -> memref<1x!tpu.dma_semaphore, #tpu.memory_space<semaphore_mem>>
      %51 = tpu.memref_squeeze %50 : memref<1x!tpu.dma_semaphore, #tpu.memory_space<semaphore_mem>> -> memref<!tpu.dma_semaphore, #tpu.memory_space<semaphore_mem>>
      tpu.wait_dma2 semaphore(%51 : memref<!tpu.dma_semaphore, #tpu.memory_space<semaphore_mem>>) src(%48 : memref<64x1024xf32, #tpu.memory_space<any>>) dst(%49 : memref<64x1024xf32, #tpu.memory_space<any>>)
    } else {
    }
    %c1_i32_37 = arith.constant 1 : i32
    %45 = arith.cmpi eq, %arg0, %c1_i32_37 : i32
    %46 = arith.extui %45 : i1 to i32
    %c7_i32_38 = arith.constant 7 : i32
    %c0_i32_39 = arith.constant 0 : i32
    %47 = arith.cmpi ne, %46, %c0_i32_39 : i32
    scf.if %47 {
      %c448_i32 = arith.constant 448 : i32
      %c0_i32_40 = arith.constant 0 : i32
      %48 = tpu.memref_slice %arg1[%c448_i32, %c0_i32_40] : memref<512x1024xf32, #tpu.memory_space<any>> -> memref<64x1024xf32, #tpu.memory_space<any>>
      %c448_i32_41 = arith.constant 448 : i32
      %c0_i32_42 = arith.constant 0 : i32
      %49 = tpu.memref_slice %arg2[%c448_i32_41, %c0_i32_42] : memref<512x1024xf32, #tpu.memory_space<any>> -> memref<64x1024xf32, #tpu.memory_space<any>>
      %50 = tpu.memref_slice %arg3[%c7_i32_38] : memref<8x!tpu.dma_semaphore, #tpu.memory_space<semaphore_mem>> -> memref<1x!tpu.dma_semaphore, #tpu.memory_space<semaphore_mem>>
      %51 = tpu.memref_squeeze %50 : memref<1x!tpu.dma_semaphore, #tpu.memory_space<semaphore_mem>> -> memref<!tpu.dma_semaphore, #tpu.memory_space<semaphore_mem>>
      tpu.wait_dma2 semaphore(%51 : memref<!tpu.dma_semaphore, #tpu.memory_space<semaphore_mem>>) src(%48 : memref<64x1024xf32, #tpu.memory_space<any>>) dst(%49 : memref<64x1024xf32, #tpu.memory_space<any>>)
    } else {
    }
    return
  }
}

</mosaic_0001>

<bundles_post_ra>
// kernel: tpu_custom_call.1
= control target key start
LH: loop header
LB: loop body
LE: loop exit
PB: predicated region body
PF: predicated region fallthrough
CT: control target
= control target key end

     0   :  { %s305_s6 = smov 0   ;;  %s427_s0 = inlined_call_operand.hbm [shape: f32[512,1024], index: 0, kind: input, shape index: {}]   ;;  %s428_s1 = inlined_call_operand.hbm [shape: f32[512,1024], index: 1, kind: output, shape index: {}]  }
   0x1 LB: > { %p223_p0 = scmp.eq.s32.totalorder %s283_s6, 0  ;;  %s285_s7 = smov [#allocation2]   ;;  %s283_s6 = sphi %s305_s6, %s11_s6  }
   0x2   : > { %s286_s8 = smov 131072   ;;  %s287_s9 = smov 0  }
   0x3   : > { %204 = dma.general (%p223_p0), %s427_s0, 8192, %s428_s1, %s285_s7, %s286_s8, [#allocation4], %s287_s9, 0  }
   0x4   : > { %p224_p1 = scmp.eq.s32.totalorder %s283_s6, 1  ;;  %s24_s16 = scalar_lea.hbm %s427_s0, 8192 }
   0x5   : > { %s25_s19 = scalar_lea.hbm %s428_s1, 8192  ;;  %s288_s20 = smov [#allocation2 + $0x1]  }
   0x6   : > { %205 = dma.general (%p223_p0), %s24_s16, 8192, %s25_s19, %s288_s20, %s286_s8, [#allocation6], %s287_s9, 0  }
   0x7   : > { %s34_s23 = scalar_lea.hbm %s427_s0, 16384  ;;  %s35_s26 = scalar_lea.hbm %s428_s1, 16384 }
   0x8   : > { %s44_s29 = scalar_lea.hbm %s427_s0, 24576  ;;  %s289_s30 = smov [#allocation2 + $0x2]  }
   0x9   : > { %206 = dma.general (%p223_p0), %s34_s23, 8192, %s35_s26, %s289_s30, %s286_s8, [#allocation8], %s287_s9, 0  }
   0xa   : > { %s45_s4 = scalar_lea.hbm %s428_s1, 24576  ;;  %s290_s5 = smov [#allocation2 + $0x3]  }
   0xb   : > { %207 = dma.general (%p223_p0), %s44_s29, 8192, %s45_s4, %s290_s5, %s286_s8, [#allocation10], %s287_s9, 0  }
   0xc   : > { %s58_s11 = scalar_lea.hbm %s427_s0, 32768  ;;  %s59_s14 = scalar_lea.hbm %s428_s1, 32768 }
   0xd   : > { %s68_s17 = scalar_lea.hbm %s427_s0, 40960  ;;  %s291_s18 = smov [#allocation2 + $0x4]  }
   0xe   : > { %209 = dma.general (%p224_p1), %s58_s11, 8192, %s59_s14, %s291_s18, %s286_s8, [#allocation12], %s287_s9, 0  }
   0xf   : > { %s69_s21 = scalar_lea.hbm %s428_s1, 40960  ;;  %s292_s22 = smov [#allocation2 + $0x5]  }
  0x10   : > { %210 = dma.general (%p224_p1), %s68_s17, 8192, %s69_s21, %s292_s22, %s286_s8, [#allocation14], %s287_s9, 0  }
  0x11   : > { %s78_s25 = scalar_lea.hbm %s427_s0, 49152  ;;  %s79_s28 = scalar_lea.hbm %s428_s1, 49152 }
  0x12   : > { %s88_s2 = scalar_lea.hbm %s427_s0, 57344  ;;  %s293_s3 = smov [#allocation2 + $0x6]  }
  0x13   : > { %211 = dma.general (%p224_p1), %s78_s25, 8192, %s79_s28, %s293_s3, %s286_s8, [#allocation16], %s287_s9, 0  }
  0x14   : > { %s89_s7 = scalar_lea.hbm %s428_s1, 57344  ;;  %s294_s10 = smov [#allocation2 + $0x7]  }
  0x15   : > { %212 = dma.general (%p224_p1), %s88_s2, 8192, %s89_s7, %s294_s10, %s286_s8, [#allocation18], %s287_s9, 0  }
  0x16   : > { %250 = dma.done.wait (%p223_p0), [#allocation2], 8192 }
  0x17   : > { %252 = vsyncadd (%p223_p0), [#allocation2], 4294959104 }
  0x18   : > { %254 = dma.done.wait (%p223_p0), [#allocation2 + $0x1], 8192 }
  0x19   : > { %256 = vsyncadd (%p223_p0), [#allocation2 + $0x1], 4294959104 }
  0x1a   : > { %258 = dma.done.wait (%p223_p0), [#allocation2 + $0x2], 8192 }
  0x1b   : > { %260 = vsyncadd (%p223_p0), [#allocation2 + $0x2], 4294959104 }
  0x1c   : > { %262 = dma.done.wait (%p223_p0), [#allocation2 + $0x3], 8192 }
  0x1d   : > { %264 = vsyncadd (%p223_p0), [#allocation2 + $0x3], 4294959104 }
  0x1e   : > { %266 = dma.done.wait (%p224_p1), [#allocation2 + $0x4], 8192 }
  0x1f   : > { %268 = vsyncadd (%p224_p1), [#allocation2 + $0x4], 4294959104 }
  0x20   : > { %270 = dma.done.wait (%p224_p1), [#allocation2 + $0x5], 8192 }
  0x21   : > { %272 = vsyncadd (%p224_p1), [#allocation2 + $0x5], 4294959104 }
  0x22   : > { %274 = dma.done.wait (%p224_p1), [#allocation2 + $0x6], 8192 }
  0x23   : > { %276 = vsyncadd (%p224_p1), [#allocation2 + $0x6], 4294959104 }
  0x24   : > { %278 = dma.done.wait (%p224_p1), [#allocation2 + $0x7], 8192 }
  0x25   : > { %280 = vsyncadd (%p224_p1), [#allocation2 + $0x7], 4294959104  ;;  %s11_s6 = sadd.s32 1, %s283_s6  }
  0x26   : > { %p8_p2 = scmp.ge.s32.totalorder %s11_s6, 2  }
  0x28   :  { %10 = sbr.rel (!%p8_p2) target bundleno = 1 (0x1), region = 70 }
  0x2d   :  { %131 = vsyncmov [#allocation2] }
  0x30   :  { %s132_s8 = vpop.sfrf %131 }
  0x31   :  { %p195_p3 = scmp.ne.s32.totalorder %s132_s8, 0 }
  0x33   :  { %136 = shalt.err (%p195_p3)  }
  0x34   :  { %138 = vsyncmov [#allocation2 + $0x1] }
  0x37   :  { %s139_s9 = vpop.sfrf %138 }
  0x38   :  { %p196_p4 = scmp.ne.s32.totalorder %s139_s9, 0 }
  0x3a   :  { %143 = shalt.err (%p196_p4)  }
  0x3b   :  { %145 = vsyncmov [#allocation2 + $0x2] }
  0x3e   :  { %s146_s11 = vpop.sfrf %145 }
  0x3f   :  { %p197_p5 = scmp.ne.s32.totalorder %s146_s11, 0 }
  0x41   :  { %150 = shalt.err (%p197_p5)  }
  0x42   :  { %152 = vsyncmov [#allocation2 + $0x3] }
  0x45   :  { %s153_s12 = vpop.sfrf %152 }
  0x46   :  { %p198_p6 = scmp.ne.s32.totalorder %s153_s12, 0 }
  0x48   :  { %157 = shalt.err (%p198_p6)  }
  0x49   :  { %159 = vsyncmov [#allocation2 + $0x4] }
  0x4c   :  { %s160_s13 = vpop.sfrf %159 }
  0x4d   :  { %p199_p7 = scmp.ne.s32.totalorder %s160_s13, 0 }
  0x4f   :  { %164 = shalt.err (%p199_p7)  }
  0x50   :  { %166 = vsyncmov [#allocation2 + $0x5] }
  0x53   :  { %s167_s0 = vpop.sfrf %166 }
  0x54   :  { %p200_p8 = scmp.ne.s32.totalorder %s167_s0, 0 }
  0x56   :  { %171 = shalt.err (%p200_p8)  }
  0x57   :  { %173 = vsyncmov [#allocation2 + $0x6] }
  0x5a   :  { %s174_s1 = vpop.sfrf %173 }
  0x5b   :  { %p201_p9 = scmp.ne.s32.totalorder %s174_s1, 0 }
  0x5d   :  { %178 = shalt.err (%p201_p9)  }
  0x5e   :  { %180 = vsyncmov [#allocation2 + $0x7] }
  0x61   :  { %s181_s6 = vpop.sfrf %180 }
  0x62   :  { %p202_p10 = scmp.ne.s32.totalorder %s181_s6, 0 }
  0x64   :  { %185 = shalt.err (%p202_p10)  }

</bundles_post_ra>
